<compile_context>
chip_gen: v7x
topology: tpu7x:2x2x1
jax: 0.10.0
libtpu: 0.0.40
codegen_flags: <defaults>
</compile_context>

<pallas_src>
import functools

import jax
import jax.numpy as jnp
from jax.experimental import pallas as pl
from jax.experimental.pallas import tpu as pltpu

_SUBLANE = 8     # f32 sublane tile
_LANE = 128      # lane tile
_VMEM_LIMIT = 32 * 1024 * 1024  # safe on v5e/v6e/v7x


def _round_up(n, m):
    return ((n + m - 1) // m) * m


# ---------------------------------------------------------------------------
# Path 1: fully fused MLP (one pallas_call, grid over layers)
# ---------------------------------------------------------------------------
def _fused_mlp_kernel(x_ref, w_ref, b_ref, o_ref, h_ref):
    layer = pl.program_id(0)
    n_layers = pl.num_programs(0)

    @pl.when(layer == 0)
    def _():
        h_ref[...] = x_ref[...]

    h = h_ref[...]
    # bf16 MXU matmul, f32 accumulation; bias add in f32 (once per layer).
    y = jnp.dot(h.astype(jnp.bfloat16), w_ref[...],
                preferred_element_type=jnp.float32)
    y = y + b_ref[...]

    is_last = layer == n_layers - 1

    @pl.when(jnp.logical_not(is_last))
    def _():
        # Hidden layer: ReLU (Dropout is identity in eval mode).
        h_ref[...] = jnp.maximum(y, 0.0)

    @pl.when(is_last)
    def _():
        o_ref[...] = y.astype(o_ref.dtype)


def fused_mlp_pallas(x_pad, w_stacked, b_stacked):
    """x_pad: (Bp, P) f32; w_stacked: (L, P, P) bf16; b_stacked: (L, 1, P) f32."""
    Bp, P = x_pad.shape
    L = w_stacked.shape[0]
    return pl.pallas_call(
        _fused_mlp_kernel,
        out_shape=jax.ShapeDtypeStruct((Bp, P), x_pad.dtype),
        grid=(L,),
        in_specs=[
            pl.BlockSpec((Bp, P), lambda l: (0, 0)),
            pl.BlockSpec((None, P, P), lambda l: (l, 0, 0)),   # per-layer weight
            pl.BlockSpec((None, 1, P), lambda l: (l, 0, 0)),   # per-layer bias
        ],
        out_specs=pl.BlockSpec((Bp, P), lambda l: (0, 0)),
        scratch_shapes=[pltpu.VMEM((Bp, P), jnp.float32)],     # resident activation
        compiler_params=pltpu.CompilerParams(
            dimension_semantics=("arbitrary",),                # layers are sequential
            vmem_limit_bytes=_VMEM_LIMIT,
        ),
    )(x_pad, w_stacked, b_stacked)


def prepare_fused_params(params):
    """Pad every layer's (W, b) to a common (P, P)/(1, P) tile and stack (done once)."""
    dims = [params[0][0].shape[0]] + [w.shape[1] for w, _ in params]
    P = max(_round_up(d, _LANE) for d in dims)
    ws, bs = [], []
    for w, b in params:
        wp = jnp.zeros((P, P), jnp.bfloat16).at[: w.shape[0], : w.shape[1]].set(
            w.astype(jnp.bfloat16))
        bp = jnp.zeros((1, P), jnp.float32).at[0, : b.shape[0]].set(
            b.astype(jnp.float32))
        ws.append(wp)
        bs.append(bp)
    return jnp.stack(ws), jnp.stack(bs), P


# ---------------------------------------------------------------------------
# Path 2: scalable M/N/K-tiled GEMM (+ fused bias / ReLU epilogue)
# ---------------------------------------------------------------------------
def _tiled_linear_kernel(x_ref, w_ref, b_ref, o_ref, acc_ref, *, apply_relu):
    k = pl.program_id(2)

    @pl.when(k == 0)
    def _():
        acc_ref[...] = jnp.zeros_like(acc_ref)

    acc_ref[...] += jnp.dot(x_ref[...], w_ref[...],
                            preferred_element_type=jnp.float32)

    @pl.when(k == pl.num_programs(2) - 1)
    def _():
        y = acc_ref[...] + b_ref[...]           # bias once, in the epilogue
        if apply_relu:
            y = jnp.maximum(y, 0.0)
        o_ref[...] = y.astype(o_ref.dtype)


def linear_pallas_tiled(x, w, b, *, apply_relu, tm=128, tn=128, tk=256):
    """y = relu?(x @ w + b); bf16 MXU inputs, f32 accumulation, tiled grid."""
    M, K = x.shape
    K2, N = w.shape
    assert K == K2
    Mp, Np, Kp = _round_up(M, tm), _round_up(N, tn), _round_up(K, tk)
    xp = jnp.zeros((Mp, Kp), jnp.bfloat16).at[:M, :K].set(x.astype(jnp.bfloat16))
    wp = jnp.zeros((Kp, Np), jnp.bfloat16).at[:K, :N].set(w.astype(jnp.bfloat16))
    bp = jnp.zeros((1, Np), jnp.float32).at[0, :N].set(b.astype(jnp.float32))

    kernel = functools.partial(_tiled_linear_kernel, apply_relu=apply_relu)
    out = pl.pallas_call(
        kernel,
        out_shape=jax.ShapeDtypeStruct((Mp, Np), jnp.float32),
        grid=(Mp // tm, Np // tn, Kp // tk),
        in_specs=[
            pl.BlockSpec((tm, tk), lambda i, j, k: (i, k)),
            pl.BlockSpec((tk, tn), lambda i, j, k: (k, j)),
            pl.BlockSpec((1, tn), lambda i, j, k: (0, j)),
        ],
        out_specs=pl.BlockSpec((tm, tn), lambda i, j, k: (i, j)),
        scratch_shapes=[pltpu.VMEM((tm, tn), jnp.float32)],
        compiler_params=pltpu.CompilerParams(
            dimension_semantics=("parallel", "parallel", "arbitrary"),
            vmem_limit_bytes=_VMEM_LIMIT,
        ),
    )(xp, wp, bp)
    return out[:M, :N]


# ---------------------------------------------------------------------------
# Module init / forward
# ---------------------------------------------------------------------------
def init_fully_connected(key, in_dim, out_dim, linear_sizes):
    """torch.nn.Linear default init: U(-1/sqrt(fan_in), 1/sqrt(fan_in))."""
    params = []
    dims = [in_dim] + list(linear_sizes) + [out_dim]
    for i in range(len(dims) - 1):
        fan_in, fan_out = dims[i], dims[i + 1]
        key, kw, kb = jax.random.split(key, 3)
        bound = 1.0 / jnp.sqrt(float(fan_in))
        w = jax.random.uniform(kw, (fan_in, fan_out), jnp.float32, -bound, bound)
        b = jax.random.uniform(kb, (fan_out,), jnp.float32, -bound, bound)
        params.append((w, b))
    return params


def fully_connected_forward(params, x, fused_params=None):
    """Forward: Linear -> ReLU -> Dropout -> ... -> Linear.
    Dropout is evaluated in inference mode (identity)."""
    # TODO(synk): training-mode dropout (pltpu.prng_seed + stateful_bernoulli mask) omitted.
    B, in_dim = x.shape
    out_dim = params[-1][0].shape[1]
    dims = [in_dim] + [w.shape[1] for w, _ in params]
    P = max(_round_up(d, _LANE) for d in dims)
    Bp = _round_up(B, _SUBLANE)

    # Rough VMEM budget for the fused path (double-buffered bf16 weight block,
    # double-buffered x/out blocks, f32 activation scratch).
    fused_bytes = 2 * P * P * 2 + 2 * P * 4 + 5 * Bp * P * 4
    if fused_bytes <= (24 << 20):
        if fused_params is None:
            fused_params = prepare_fused_params(params)
        w_stk, b_stk, P = fused_params
        xp = jnp.zeros((Bp, P), jnp.float32).at[:B, :in_dim].set(x)
        out = fused_mlp_pallas(xp, w_stk, b_stk)
        return out[:B, :out_dim]

    # Fallback: per-layer tiled GEMM for layers too big to hold as one block.
    h = x
    for i, (w, b) in enumerate(params):
        h = linear_pallas_tiled(h, w, b, apply_relu=(i != len(params) - 1))
    return h


if __name__ == "__main__":
    batch = 2
    in_dim = 32
    linear_sizes = (64, 32)
    out_dim = 16

    key = jax.random.PRNGKey(0)
    key, kx = jax.random.split(key)
    x = jax.random.normal(kx, (batch, in_dim), jnp.float32)

    params = init_fully_connected(key, in_dim, out_dim, linear_sizes)
    fused_params = prepare_fused_params(params)  # pad/stack once, reuse per forward

    out = fully_connected_forward(params, x, fused_params)
    out = jax.block_until_ready(out)
    assert out.shape == (batch, out_dim)

    # Reference mirroring kernel numerics (bf16 MXU inputs, f32 accumulation).
    def ref_forward(params, x):
        h = x
        for i, (w, b) in enumerate(params):
            h = jnp.dot(h.astype(jnp.bfloat16), w.astype(jnp.bfloat16),
                        preferred_element_type=jnp.float32) + b
            if i != len(params) - 1:
                h = jnp.maximum(h, 0.0)
        return h

    ref = ref_forward(params, x)
    assert jnp.allclose(out, ref, atol=2e-3, rtol=2e-3), float(
        jnp.max(jnp.abs(out - ref)))

    # Exercise the scalable tiled-GEMM path once at a realistic layer size.
    key, kx2, kp2 = jax.random.split(key, 3)
    xb = jax.random.normal(kx2, (256, 512), jnp.float32)
    (wb, bb), = init_fully_connected(kp2, 512, 384, ())  # single Linear 512->384
    out_big = jax.block_until_ready(
        linear_pallas_tiled(xb, wb, bb, apply_relu=True))
    ref_big = jnp.maximum(
        jnp.dot(xb.astype(jnp.bfloat16), wb.astype(jnp.bfloat16),
                preferred_element_type=jnp.float32) + bb, 0.0)
    assert out_big.shape == (256, 384)
    assert jnp.allclose(out_big, ref_big, atol=5e-3, rtol=5e-3), float(
        jnp.max(jnp.abs(out_big - ref_big)))

    print("KERNEL_OK")
</pallas_src>

<mosaic_0001>
module attributes {stable_mosaic.version = 11 : i64} {
  func.func @_fused_mlp_kernel(%arg0: i32, %arg1: memref<8x128xf32, #tpu.memory_space<vmem>>, %arg2: memref<1x128x128xbf16, #tpu.memory_space<vmem>>, %arg3: memref<1x1x128xf32, #tpu.memory_space<vmem>>, %arg4: memref<8x128xf32, #tpu.memory_space<vmem>>, %arg5: memref<8x128xf32, #tpu.memory_space<vmem>>) attributes {dimension_semantics = [#tpu.dimension_semantics<arbitrary>], iteration_bounds = array<i64: 3>, scalar_prefetch = 0 : i64, scratch_operands = 1 : i64, tpu.core_type = #tpu.core_type<tc>, window_params = [{pipeline_mode = #tpu.pipeline_mode<synchronous>, transform_indices = @transform_0, window_bounds = array<i64: 8, 128>}, {transform_indices = @transform_1, window_bounds = array<i64: 1, 128, 128>}, {transform_indices = @transform_2, window_bounds = array<i64: 1, 1, 128>}, {pipeline_mode = #tpu.pipeline_mode<synchronous>, transform_indices = @transform_3, window_bounds = array<i64: 8, 128>}]} {
    %c0_i32 = arith.constant 0 : i32
    %0 = arith.cmpi eq, %arg0, %c0_i32 : i32
    %1 = arith.extui %0 : i1 to i32
    %c0_i32_0 = arith.constant 0 : i32
    %2 = arith.cmpi ne, %1, %c0_i32_0 : i32
    scf.if %2 {
      %c0_10 = arith.constant 0 : index
      %c0_11 = arith.constant 0 : index
      %18 = vector.load %arg1[%c0_10, %c0_11] : memref<8x128xf32, #tpu.memory_space<vmem>>, vector<8x128xf32>
      %c0_12 = arith.constant 0 : index
      %c0_13 = arith.constant 0 : index
      %19 = vector.load %arg5[%c0_12, %c0_13] : memref<8x128xf32, #tpu.memory_space<vmem>>, vector<8x128xf32>
      tpu.vector_store %arg5[%c0_12, %c0_13], %18 {strides = array<i32>} : memref<8x128xf32, #tpu.memory_space<vmem>>, vector<8x128xf32>,
    } else {
    }
    %c0 = arith.constant 0 : index
    %c0_1 = arith.constant 0 : index
    %3 = vector.load %arg5[%c0, %c0_1] : memref<8x128xf32, #tpu.memory_space<vmem>>, vector<8x128xf32>
    %4 = arith.truncf %3 : vector<8x128xf32> to vector<8x128xbf16>
    %c0_2 = arith.constant 0 : index
    %c0_3 = arith.constant 0 : index
    %c0_4 = arith.constant 0 : index
    %5 = vector.load %arg2[%c0_2, %c0_3, %c0_4] : memref<1x128x128xbf16, #tpu.memory_space<vmem>>, vector<1x128x128xbf16>
    %6 = vector.shape_cast %5 : vector<1x128x128xbf16> to vector<128x128xbf16>
    %cst = arith.constant dense<0.000000e+00> : vector<8x128xf32>
    %7 = tpu.matmul %4, %6, %cst {dimension_numbers = #tpu.dot_dimension_numbers<[1], [0], [0], [1], [0, 0, 1, 1], [], []>} : vector<8x128xbf16>, vector<128x128xbf16>, vector<8x128xf32> -> vector<8x128xf32>
    %c0_5 = arith.constant 0 : index
    %c0_6 = arith.constant 0 : index
    %c0_7 = arith.constant 0 : index
    %8 = vector.load %arg3[%c0_5, %c0_6, %c0_7] : memref<1x1x128xf32, #tpu.memory_space<vmem>>, vector<1x1x128xf32>
    %9 = vector.shape_cast %8 : vector<1x1x128xf32> to vector<1x128xf32>
    %10 = vector.broadcast %9 : vector<1x128xf32> to vector<8x128xf32>
    %11 = arith.addf %7, %10 : vector<8x128xf32>
    %c2_i32 = arith.constant 2 : i32
    %12 = arith.cmpi eq, %arg0, %c2_i32 : i32
    %true = arith.constant true
    %13 = arith.xori %12, %true : i1
    %14 = arith.extui %13 : i1 to i32
    %c0_i32_8 = arith.constant 0 : i32
    %15 = arith.cmpi ne, %14, %c0_i32_8 : i32
    scf.if %15 {
      %cst_10 = arith.constant 0.000000e+00 : f32
      %18 = vector.broadcast %cst_10 : f32 to vector<8x128xf32>
      %19 = arith.maximumf %11, %18 : vector<8x128xf32>
      %c0_11 = arith.constant 0 : index
      %c0_12 = arith.constant 0 : index
      %20 = vector.load %arg5[%c0_11, %c0_12] : memref<8x128xf32, #tpu.memory_space<vmem>>, vector<8x128xf32>
      tpu.vector_store %arg5[%c0_11, %c0_12], %19 {strides = array<i32>} : memref<8x128xf32, #tpu.memory_space<vmem>>, vector<8x128xf32>,
    } else {
    }
    %16 = arith.extui %12 : i1 to i32
    %c0_i32_9 = arith.constant 0 : i32
    %17 = arith.cmpi ne, %16, %c0_i32_9 : i32
    scf.if %17 {
      %c0_10 = arith.constant 0 : index
      %c0_11 = arith.constant 0 : index
      %18 = vector.load %arg4[%c0_10, %c0_11] : memref<8x128xf32, #tpu.memory_space<vmem>>, vector<8x128xf32>
      tpu.vector_store %arg4[%c0_10, %c0_11], %11 {strides = array<i32>} : memref<8x128xf32, #tpu.memory_space<vmem>>, vector<8x128xf32>,
    } else {
    }
    return
  }
  func.func @transform_0(%arg0: i32) -> (i32, i32) {
    %c0_i32 = arith.constant 0 : i32
    %c0_i32_0 = arith.constant 0 : i32
    %c0_i32_1 = arith.constant 0 : i32
    return %c0_i32, %c0_i32_0 : i32, i32
  }
  func.func @transform_1(%arg0: i32) -> (i32, i32, i32) {
    %c0_i32 = arith.constant 0 : i32
    %c0_i32_0 = arith.constant 0 : i32
    %c0_i32_1 = arith.constant 0 : i32
    return %arg0, %c0_i32, %c0_i32_0 : i32, i32, i32
  }
  func.func @transform_2(%arg0: i32) -> (i32, i32, i32) {
    %c0_i32 = arith.constant 0 : i32
    %c0_i32_0 = arith.constant 0 : i32
    %c0_i32_1 = arith.constant 0 : i32
    return %arg0, %c0_i32, %c0_i32_0 : i32, i32, i32
  }
  func.func @transform_3(%arg0: i32) -> (i32, i32) {
    %c0_i32 = arith.constant 0 : i32
    %c0_i32_0 = arith.constant 0 : i32
    %c0_i32_1 = arith.constant 0 : i32
    return %c0_i32, %c0_i32_0 : i32, i32
  }
}

</mosaic_0001>

<bundles_post_ra>
// kernel: tpu_custom_call.1
= control target key start
LH: loop header
LB: loop body
LE: loop exit
PB: predicated region body
PF: predicated region fallthrough
CT: control target
= control target key end

     0   :  { %8 = vsyncpa [#allocation4], 0  ;;  %s888_s0 = inlined_call_operand.hbm [shape: f32[8,128], index: 0, kind: input, shape index: {}]   ;;  %s889_s1 = inlined_call_operand.hbm [shape: bf16[3,128,128], index: 1, kind: input, shape index: {}]   ;;  %s890_s2 = inlined_call_operand.vmem [shape: f32[3,1,128], index: 2, kind: input, shape index: {}]   ;;  %s891_s3 = inlined_call_operand.hbm [shape: f32[8,128], index: 3, kind: output, shape index: {}]  }
   0x1   :  { %9 = vsyncpa [#allocation7], 0 }
   0x2   :  { %11 = vsyncpa [#allocation7 + $0x1], 0 }
   0x3   :  { %12 = vsyncpa [#allocation5], 0  ;;  %s693_s12 = smov 0   ;;  %s695_s13 = smov 0  }
   0x4   :  { %s697_s14 = smov 0   ;;  %s699_s15 = smov 0  }
   0x5 LB: > { %s712_s16 = sadd.s32 4294967295, %s664_s15   ;;  %s715_s17 = sadd.s32 1, %s664_s15   ;;  %s664_s15 = sphi %s699_s15, %s910_s15   ;;  %s660_s14 = sphi %s697_s14, %s909_s14   ;;  %s656_s13 = sphi %s695_s13, %s908_s13   ;;  %s652_s12 = sphi %s693_s12, %s907_s12  }
   0x6   : > { %s43_s18 = ssub.s32 %s664_s15, %s715_s17  ;;  %s46_s19 = sadd.s32 1, %s660_s14 }
   0x7   : > { %p44_p0 = scmp.eq.s32.totalorder %s43_s18, 0  ;;  %p53_p1 = scmp.ne.s32.totalorder %s660_s14, %s656_s13 }
   0x8   : > { %p54_p2 = scmp.eq.s32.totalorder %s664_s15, 0  ;;  %p59_p3 = scmp.ne.s32.totalorder %s656_s13, %s652_s12 }
   0x9   : > { %s725_s20 = scalar_select %p44_p0, %s660_s14, %s46_s19  }
   0xa   : > { %p727_p4 = por %p54_p2, %p53_p1  ;;  %p892_p5 = scmp.eq.s32.totalorder %s712_s16, 0 }
   0xb   : > { %p414_p6 = scmp.ge.s32.totalorder %s664_s15, 1  ;;  %p117_p7 = scmp.lt.s32.totalorder %s664_s15, 4 }
   0xc   : > { %p736_p8 = por %p892_p5, %p59_p3  ;;  %s666_s24 = smov [#allocation3]  }
   0xd   : > { %p741_p10 = pnand %p414_p6, %p117_p7  ;;  %s130_s25 = sshll.u32 %s666_s24, 4  ;;  %s131_s25 = int_to_ptr.vmem [resolvable:$true] %s130_s25 }
   0xe   : > { %s897_s22 = scalar_select %p736_p8, 1, 0 }
   0xf   : > { %s898_s23 = scalar_select %p741_p10, 1, 0 }
  0x10   : > { %p479_p11 = pneg %p741_p10  ;;  %p488_p12 = scmp.lt.s32.totalorder %s664_s15, 3 }
  0x11   : > { %s141_s26 = sand.u32 1, %s660_s14   ;;  %s538_s5 = scalar_lea.hbm %s888_s0, 128 }
  0x12   : > { %p751_p13 = pnand %p479_p11, %p892_p5  ;;  %p757_p0 = pnand %p488_p12, %p727_p4 }
  0x13   : > { %s417_s29 = sshll.u32 %s141_s26, 6  ;;  %p539_p1 = scmp.ne.s32.totalorder %s888_s0, %s538_s5 }
  0x14   : > { %s900_s28 = scalar_select %p757_p0, 1, 0 }
  0x15   : > { %p540_p2 = pneg %p751_p13  ;;  %p545_p4 = scmp.lt.u32.totalorder %s538_s5, %s888_s0 }
  0x17   : > { %p541_p3 = pnand %p540_p2, %p539_p1 }
  0x19   : > { %p542_p6 = pneg %p541_p3 }
  0x1b   : > { %p547_p7 = pnand %p545_p4, %p542_p6 }
  0x1d   : > { %550 = shalt.err (!%p547_p7)
}
  0x1e   : > { %s551_s10 = scalar_lea.vmem %s131_s25, 128  ;;  %p559_p5 = scmp.lt.s32.totalorder %s131_s25, %s131_s25 }
  0x1f   : > { %p552_p11 = scmp.ne.s32.totalorder %s131_s25, %s551_s10  ;;  %p560_p8 = scmp.lt.s32.totalorder %s551_s10, %s551_s10 }
  0x21   : > { %p554_p12 = pnand %p552_p11, %p540_p2  ;;  %p561_p10 = por %p560_p8, %p559_p5 }
  0x23   : > { %p555_p9 = pneg %p554_p12 }
  0x25   : > { %p562_p0 = pnand %p561_p10, %p555_p9 }
  0x27   : > { %565 = shalt.err (!%p562_p0)
}
  0x28   : > { %482 = dma.hbm_to_vmem [thread:$0]  (!%p751_p13), %s888_s0, 128, %s131_s25, [#allocation4]  }
  0x29   : > { %s439_s18 = sshll.u32 %s664_s15, 10  ;;  %s145_s30 = scalar_lea.vmem [#allocation6], %s417_s29 }
  0x2a   : > { %s781_s24 = scalar_lea.hbm %s889_s1, %s439_s18  ;;  %s152_s4 = sshll.u32 %s145_s30, 4  ;;  %s783_s4 = int_to_ptr.vmem [resolvable:$true] %s152_s4 }
  0x2b   : > { %s785_s27 = scalar_lea.sflag [#allocation7], %s141_s26  ;;  %s566_s5 = scalar_lea.hbm %s781_s24, 1024 }
  0x2c   : > { %p567_p5 = scmp.ne.s32.totalorder %s781_s24, %s566_s5  ;;  %p901_p8 = scmp.ne.s32.totalorder %s900_s28, 0 }
  0x2d   : > { %s571_s6 = scalar_lea.hbm %s889_s1, 3072  ;;  %p572_p0 = scmp.lt.u32.totalorder %s781_s24, %s889_s1 }
  0x2e   : > { %p568_p9 = pneg %p901_p8  ;;  %p573_p1 = scmp.lt.u32.totalorder %s571_s6, %s566_s5 }
  0x2f   : > { %p575_p3 = scmp.lt.u32.totalorder %s566_s5, %s781_s24 }
  0x30   : > { %p569_p10 = pnand %p568_p9, %p567_p5  ;;  %p574_p2 = por %p573_p1, %p572_p0 }
  0x32   : > { %p570_p13 = pneg %p569_p10  ;;  %p576_p6 = por %p575_p3, %p574_p2 }
  0x34   : > { %p577_p4 = pnand %p576_p6, %p570_p13 }
  0x36   : > { %580 = shalt.err (!%p577_p4)
}
  0x37   : > { %s581_s26 = scalar_lea.vmem %s783_s4, 1024  ;;  %s667_s29 = smov [#allocation6]  }
  0x38   : > { %p582_p7 = scmp.ne.s32.totalorder %s783_s4, %s581_s26  ;;  %s586_s9 = sshll.u32 %s667_s29, 4  ;;  %s587_s9 = int_to_ptr.vmem [resolvable:$false] %s586_s9 }
  0x39   : > { %s588_s10 = scalar_lea.vmem %s587_s9, 2048  ;;  %p589_p5 = scmp.lt.s32.totalorder %s783_s4, %s587_s9 }
  0x3a   : > { %p584_p11 = pnand %p582_p7, %p568_p9  ;;  %p590_p10 = scmp.lt.s32.totalorder %s588_s10, %s581_s26 }
  0x3c   : > { %p585_p12 = pneg %p584_p11  ;;  %p591_p0 = por %p590_p10, %p589_p5 }
  0x3e   : > { %p592_p1 = pnand %p591_p0, %p585_p12 }
  0x40   : > { %595 = shalt.err (!%p592_p1)
}
  0x41   : > { %s668_s11 = smov 64   ;;  %s669_s12 = smov 4  }
  0x42   : > { %486 = dma.hbm_to_vmem [thread:$0]  (!%p901_p8), %s781_s24, 1024, %s783_s4, %s785_s27, %s668_s11, %s668_s11, %s669_s12  }
  0x43   : > { %p902_p9 = scmp.ne.s32.totalorder %s898_s23, 0 }
  0x44   : > { %p903_p13 = scmp.eq.s32.totalorder (!%p902_p9), %s712_s16, 0 }
  0x45   : > { %170 = sbr.rel (%p902_p9) target bundleno = 375 (0x177), region = 32 }
  0x4c   : > { %639 = dma.done.wait (%p903_p13), [#allocation4], 128   ;;  %p904_p2 = pmov %p903_p13 }
  0x4d   : > { %s176_s18 = sand.u32 1, %s656_s13   ;;  %p905_p3 = scmp.ne.s32.totalorder %s897_s22, 0 }
  0x4e   : > { %641 = vsyncadd (%p904_p2), [#allocation4], 4294967168  ;;  %s422_s19 = sshll.u32 %s176_s18, 6  ;;  %s177_s21 = scalar_lea.sflag [#allocation7], %s176_s18 }
  0x4f   : > { %s820_s30 = scalar_lea.vmem [#allocation6], %s422_s19 }
  0x50   : > { %643 = dma.done.wait (%p905_p3), %s177_s21, 1024  }
  0x51   : > { %645 = vsyncadd (%p905_p3), %s177_s21, 4294966272  ;;  %p201_p8 = scmp.lt.s32.totalorder %s712_s16, 2  ;;  %p906_p6 = scmp.ne.s32.totalorder %s712_s16, 0 }
  0x52   : > { %v209_v0 = vld [vmem:[#allocation3] sm:$0xff] (!%p906_p6) }
  0x53   : > { %s828_s23 = scalar_select %p201_p8, %s712_s16, 2 }
  0x54   : > { %208 = sbr.rel (%p906_p6) target bundleno = 91 (0x5b), region = 44  ;;  %210 = vst [vmem:[#allocation2] sm:$0xff] (!%p906_p6), %v209_v0 }
  0x55   : > { %s203_s4 = scalar_lea.vmem %s890_s2, %s828_s23 }
  0x5b PF: > { %v530_v1 = vld [vmem:[%s820_s30] sm:$0xff]   ;;  %v670_v2 = vmov 0.0   ;;  %v531_v3 = vld [vmem:[%s820_s30 + $0x8] sm:$0xff]   ;;  %vm671_vm0 = vmmov 0   ;;  %v532_v4 = vld [vmem:[%s820_s30 + $0x10] sm:$0xff]   ;;  %p433_p4 = scmp.eq.s32.totalorder %s712_s16, 2 }
  0x5c   : > { %449 = vmatprep.subr.bf16.mxu0 %v670_v2  ;;  %465 = vmatprep.mubr.msk.bf16.mxu0 %vm671_vm0, %v670_v2  ;;  %v533_v5 = vld [vmem:[%s820_s30 + $0x18] sm:$0xff]   ;;  %v534_v6 = vld [vmem:[%s820_s30 + $0x20] sm:$0xff]   ;;  %v535_v7 = vld [vmem:[%s820_s30 + $0x28] sm:$0xff]  }
  0x5d   : > { %450 = vmatpush3.bf16.msra.mxu0 %v530_v1  ;;  %v536_v8 = vld [vmem:[%s820_s30 + $0x30] sm:$0xff]   ;;  %v537_v9 = vld [vmem:[%s820_s30 + $0x38] sm:$0xff]  }
  0x5e   : > { %451 = vmatprep.subr.bf16.mxu0 %v670_v2  ;;  %v211_v10 = vld [vmem:[#allocation2] sm:$0xff] }
  0x5f   : > { %v212_v11 = vpack.c.bf16 %v211_v10, %v211_v10  ;;  %v424_v12 = vld [vmem:[%s203_s4] ss:$0 sm:$0xff] }
  0x61   : > { %452 = vmatpush3.bf16.msra.mxu0 %v531_v3 }
  0x62   : > { %453 = vmatprep.subr.bf16.mxu0 %v670_v2 }
  0x65   : > { %454 = vmatpush3.bf16.msra.mxu0 %v532_v4 }
  0x66   : > { %455 = vmatprep.subr.bf16.mxu0 %v670_v2 }
  0x69   : > { %456 = vmatpush3.bf16.msra.mxu0 %v533_v5 }
  0x6a   : > { %457 = vmatprep.subr.bf16.mxu0 %v670_v2 }
  0x6d   : > { %458 = vmatpush3.bf16.msra.mxu0 %v534_v6 }
  0x6e   : > { %459 = vmatprep.subr.bf16.mxu0 %v670_v2 }
  0x71   : > { %460 = vmatpush3.bf16.msra.mxu0 %v535_v7 }
  0x72   : > { %461 = vmatprep.subr.bf16.mxu0 %v670_v2 }
  0x75   : > { %462 = vmatpush3.bf16.msra.mxu0 %v536_v8 }
  0x76   : > { %463 = vmatprep.subr.bf16.mxu0 %v670_v2 }
  0x79   : > { %464 = vmatpush3.bf16.msra.mxu0 %v537_v9 }
  0x7c   : > { %466 = vmatmul.mubr.bf16.vlgmr.msra.gmra.mrb[0].mxu0 %v212_v11 }
 0x14c   : > { %328 = sbr.rel (%p433_p4) target bundleno = 341 (0x155), region = 48 }
 0x14f   : > { %v318_v13 = vpop.f32.mrb[0].mxu0 }
 0x150   : > { %v319_v14 = vadd.f32 %v424_v12, %v318_v13  ;;  %v467_v15 = vpop.f32.mrb[1].mxu0 }
 0x151   : > { %v321_v16 = vpop.f32.mrb[2].mxu0 }
 0x152   : > { %v468_v17 = vpop.f32.mrb[3].mxu0  ;;  %v329_v18 = vmax.f32 (!%p433_p4), %v319_v14, 0.0 }
 0x154   : > { %330 = vst [vmem:[#allocation2] sm:$0xff] %v329_v18 }
 0x155 PF: > { %p434_p7 = scmp.ne.s32.totalorder %s712_s16, 2 }
 0x156   : > { %334 = vst [vmem:[#allocation8] sm:$0xff] (!%p434_p7), %v319_v14 }
 0x157   : > { %333 = sbr.rel (%p434_p7) target bundleno = 350 (0x15e), region = 52 }
 0x15e PF: > { %s672_s5 = smov [#allocation8]  }
 0x15f   : > { %s342_s15 = sshll.u32 %s672_s5, 4  ;;  %s343_s15 = int_to_ptr.vmem [resolvable:$true] %s342_s15 }
 0x160   : > { %s596_s25 = scalar_lea.vmem %s343_s15, 128  ;;  %p603_p10 = scmp.lt.s32.totalorder %s343_s15, %s343_s15 }
 0x161   : > { %p597_p11 = scmp.ne.s32.totalorder %s343_s15, %s596_s25  ;;  %p604_p0 = scmp.lt.s32.totalorder %s596_s25, %s596_s25 }
 0x163   : > { %p598_p12 = pnand %p597_p11, %p433_p4  ;;  %p605_p1 = por %p604_p0, %p603_p10 }
 0x165   : > { %p599_p5 = pneg %p598_p12 }
 0x167   : > { %p606_p9 = pnand %p605_p1, %p599_p5 }
 0x169   : > { %609 = shalt.err (!%p606_p9)
}
 0x16a   : > { %s610_s8 = scalar_lea.hbm %s891_s3, 128 }
 0x16b   : > { %p611_p13 = scmp.ne.s32.totalorder %s891_s3, %s610_s8  ;;  %p616_p8 = scmp.lt.u32.totalorder %s610_s8, %s891_s3 }
 0x16d   : > { %p612_p2 = pnand %p611_p13, %p433_p4 }
 0x16f   : > { %p613_p3 = pneg %p612_p2 }
 0x171   : > { %p618_p6 = pnand %p616_p8, %p613_p3 }
 0x173   : > { %621 = shalt.err (!%p618_p6)
}
 0x174   : > { %476 = dma.vmem_to_hbm [thread:$0]  (%p433_p4), %s343_s15, 128, %s891_s3, [#allocation5]  }
 0x175   : > { %647 = dma.done.wait (%p433_p4), [#allocation5], 128  }
 0x176   : > { %649 = vsyncadd (%p433_p4), [#allocation5], 4294967168 }
 0x177 PF: > { %p15_p7 = scmp.ge.s32.totalorder %s715_s17, 5   ;;  %s907_s12 = smov %s656_s13 }
 0x178   : > { %s908_s13 = smov %s660_s14  ;;  %s909_s14 = smov %s725_s20 }
 0x179   : > { %s910_s15 = smov %s715_s17  ;;  %17 = sbr.rel (!%p15_p7) target bundleno = 5 (0x5), region = 89 }
 0x180   :  { %355 = vsyncpa [#allocation4], 1 }
 0x181   :  { %357 = vsyncpa [#allocation4 + $0x1], 1 }
 0x182   :  { %358 = vsyncpa [#allocation7], 1 }
 0x183   :  { %360 = vsyncpa [#allocation7 + $0x1], 1 }
 0x184   :  { %361 = vsyncpa [#allocation5], 1 }
 0x185   :  { %363 = vsyncpa [#allocation5 + $0x1], 1 }

</bundles_post_ra>
